<compile_context>
chip_gen: v6e
topology: v6e:2x2x1
jax: 0.10.0
libtpu: 0.0.40
codegen_flags: <defaults>
</compile_context>

<pallas_src>
import functools

import jax
import jax.numpy as jnp
from jax.experimental import pallas as pl
from jax.experimental.pallas import tpu as pltpu

HIDDEN = 32
SEQ = 8
BATCH = 2
LN_EPS = 1e-5
SLAB_ROWS = 40  # HIDDEN (W.T rows) + 4 param rows, padded up to a multiple of 8


def factor_attn_kernel(x_ref, p_ref, o_ref, *, batch, seq, hidden):
    # x_ref: (B*S, H)   — the entire problem in one block / one grid step.
    # p_ref: (40, H)    — rows [0:H)=W.T, H=W bias, H+1=V row, H+2=gamma, H+3=beta.
    x = x_ref[...]                                   # (B*S, H) f32
    p = p_ref[...]                                   # (40, H)  f32, loaded once

    wT = p[0:hidden, :]                              # (H, H), MXU-natural layout
    wb = p[hidden:hidden + 1, :]                     # (1, H)
    v  = p[hidden + 1:hidden + 2, :]                 # (1, H)
    g  = p[hidden + 2:hidden + 3, :]                 # (1, H)
    b  = p[hidden + 3:hidden + 4, :]                 # (1, H)

    # u = tanh(x @ W.T + b): single (16,32)@(32,32) MXU call for both batches.
    u = jnp.tanh(
        jnp.dot(x, wT, preferred_element_type=jnp.float32) + wb
    )                                                # (B*S, H)

    # scores = V(u): output width 1 -> VPU multiply + XLU lane reduction
    # instead of a wasted width-1 MXU push.  V's bias is omitted because
    # softmax over the sequence axis is shift-invariant.
    scores = jnp.sum(u * v, axis=-1, keepdims=True)  # (B*S, 1)

    # Per-batch softmax over the sequence dim (PyTorch dim=1).  batch=2,
    # seq=8: the two (8,1) segments are static, sublane-tile-aligned slices;
    # only the tiny sub-reductions are per-batch, the rest of the tail stays
    # batched over all 16 rows.
    attn_segs = []
    for bidx in range(batch):
        lo = bidx * seq
        sb = scores[lo:lo + seq, :]                  # (S, 1)
        m = jnp.max(sb, axis=0, keepdims=True)       # (1, 1)
        e = jnp.exp(sb - m)                          # (S, 1)
        attn_segs.append(e / jnp.sum(e, axis=0, keepdims=True))
    attn = jnp.concatenate(attn_segs, axis=0)        # (B*S, 1)

    # TODO(synk): nn.Dropout(0.1) is identity in eval mode; train-mode dropout
    # (pltpu.prng_random_bits masking) is not implemented here.

    # Gated residual + LayerNorm over hidden, batched over all 16 rows,
    # written back with one full-block store.
    y = x + x * attn                                 # (B*S, H)
    mean = jnp.mean(y, axis=-1, keepdims=True)
    var = jnp.mean((y - mean) ** 2, axis=-1, keepdims=True)
    norm = (y - mean) * jax.lax.rsqrt(var + LN_EPS)
    o_ref[...] = (norm * g + b).astype(o_ref.dtype)


@jax.jit
def factor_attention_layer(x, w_weight, w_bias, v_weight, v_bias,
                           ln_gamma, ln_beta):
    """x: (B, S, H); w_weight: (H, H) torch (out, in); v_weight: (1, H)."""
    B, S, H = x.shape
    del v_bias  # softmax(V(u) + c, dim=seq) == softmax(V(u)): bias is a no-op.

    x2 = x.reshape(B * S, H)        # contiguous reshape: free (no transpose)

    # Single packed parameter slab: W.T (MXU-natural), then the four (1,H)
    # parameter rows, padded to a multiple of 8 sublanes.  One DMA instead of
    # five; the (32,32) transpose + concat are trivial wrapper-side XLA ops.
    slab = jnp.concatenate(
        [
            w_weight.T.astype(x.dtype),              # rows [0, H)
            w_bias.reshape(1, H).astype(x.dtype),     # row H
            v_weight.reshape(1, H).astype(x.dtype),   # row H+1
            ln_gamma.reshape(1, H).astype(x.dtype),   # row H+2
            ln_beta.reshape(1, H).astype(x.dtype),    # row H+3
            jnp.zeros((SLAB_ROWS - (H + 4), H), x.dtype),  # sublane pad
        ],
        axis=0,
    )                                                 # (40, H)

    grid_spec = pltpu.PrefetchScalarGridSpec(
        num_scalar_prefetch=0,
        grid=(1,),                  # whole (~2 KiB) problem in one grid step
        in_specs=[
            pl.BlockSpec((B * S, H), lambda i: (0, 0)),       # x, flattened
            pl.BlockSpec((SLAB_ROWS, H), lambda i: (0, 0)),   # packed params
        ],
        out_specs=pl.BlockSpec((B * S, H), lambda i: (0, 0)),
    )

    out2 = pl.pallas_call(
        functools.partial(factor_attn_kernel, batch=B, seq=S, hidden=H),
        out_shape=jax.ShapeDtypeStruct((B * S, H), x.dtype),
        grid_spec=grid_spec,
        compiler_params=pltpu.CompilerParams(
            dimension_semantics=("arbitrary",),
        ),
    )(x2, slab)

    return out2.reshape(B, S, H)


def _reference(x, w_weight, w_bias, v_weight, v_bias, ln_gamma, ln_beta):
    # Pure-JAX reference mirroring the PyTorch forward (dropout in eval mode).
    u = jnp.tanh(x @ w_weight.T + w_bias)
    scores = u @ v_weight.T + v_bias                   # (B, S, 1)
    attn = jax.nn.softmax(scores, axis=1)
    y = x + x * attn
    mean = jnp.mean(y, axis=-1, keepdims=True)
    var = jnp.mean((y - mean) ** 2, axis=-1, keepdims=True)
    return (y - mean) / jnp.sqrt(var + LN_EPS) * ln_gamma + ln_beta


if __name__ == "__main__":
    key = jax.random.PRNGKey(0)
    kx, kw, kwb, kv, kvb = jax.random.split(key, 5)

    x = jax.random.normal(kx, (BATCH, SEQ, HIDDEN), dtype=jnp.float32)

    # Deterministic parameter init (torch nn.Linear-style uniform ranges).
    bound_w = 1.0 / jnp.sqrt(HIDDEN)
    w_weight = jax.random.uniform(kw, (HIDDEN, HIDDEN), jnp.float32, -bound_w, bound_w)
    w_bias = jax.random.uniform(kwb, (HIDDEN,), jnp.float32, -bound_w, bound_w)
    v_weight = jax.random.uniform(kv, (1, HIDDEN), jnp.float32, -bound_w, bound_w)
    v_bias = jax.random.uniform(kvb, (1,), jnp.float32, -bound_w, bound_w)
    ln_gamma = jnp.ones((HIDDEN,), jnp.float32)
    ln_beta = jnp.zeros((HIDDEN,), jnp.float32)

    out = factor_attention_layer(x, w_weight, w_bias, v_weight, v_bias,
                                 ln_gamma, ln_beta)
    out = jax.block_until_ready(out)

    ref = _reference(x, w_weight, w_bias, v_weight, v_bias, ln_gamma, ln_beta)
    assert out.shape == (BATCH, SEQ, HIDDEN)
    assert jnp.allclose(out, ref, atol=1e-5, rtol=1e-5)

    print("KERNEL_OK")
</pallas_src>

<mosaic_0001>
module attributes {stable_mosaic.version = 11 : i64} {
  func.func @factor_attn_kernel(%arg0: i32, %arg1: memref<16x32xf32, #tpu.memory_space<vmem>>, %arg2: memref<40x32xf32, #tpu.memory_space<vmem>>, %arg3: memref<16x32xf32, #tpu.memory_space<vmem>>) attributes {dimension_semantics = [#tpu.dimension_semantics<arbitrary>], iteration_bounds = array<i64: 1>, scalar_prefetch = 0 : i64, scratch_operands = 0 : i64, tpu.core_type = #tpu.core_type<tc>, window_params = [{pipeline_mode = #tpu.pipeline_mode<synchronous>, transform_indices = @transform_0, window_bounds = array<i64: 16, 32>}, {pipeline_mode = #tpu.pipeline_mode<synchronous>, transform_indices = @transform_1, window_bounds = array<i64: 40, 32>}, {pipeline_mode = #tpu.pipeline_mode<synchronous>, transform_indices = @transform_2, window_bounds = array<i64: 16, 32>}]} {
    %c0 = arith.constant 0 : index
    %c0_0 = arith.constant 0 : index
    %0 = vector.load %arg1[%c0, %c0_0] : memref<16x32xf32, #tpu.memory_space<vmem>>, vector<16x32xf32>
    %c0_1 = arith.constant 0 : index
    %c0_2 = arith.constant 0 : index
    %1 = vector.load %arg2[%c0_1, %c0_2] : memref<40x32xf32, #tpu.memory_space<vmem>>, vector<40x32xf32>
    %2 = vector.extract_strided_slice %1 {offsets = [0, 0], sizes = [32, 32], strides = [1, 1]} : vector<40x32xf32> to vector<32x32xf32>
    %3 = vector.extract_strided_slice %1 {offsets = [32, 0], sizes = [1, 32], strides = [1, 1]} : vector<40x32xf32> to vector<1x32xf32>
    %4 = vector.extract_strided_slice %1 {offsets = [33, 0], sizes = [1, 32], strides = [1, 1]} : vector<40x32xf32> to vector<1x32xf32>
    %5 = vector.extract_strided_slice %1 {offsets = [34, 0], sizes = [1, 32], strides = [1, 1]} : vector<40x32xf32> to vector<1x32xf32>
    %6 = vector.extract_strided_slice %1 {offsets = [35, 0], sizes = [1, 32], strides = [1, 1]} : vector<40x32xf32> to vector<1x32xf32>
    %cst = arith.constant dense<0.000000e+00> : vector<16x32xf32>
    %7 = tpu.matmul %0, %2, %cst {dimension_numbers = #tpu.dot_dimension_numbers<[1], [0], [0], [1], [0, 0, 1, 1], [], []>} : vector<16x32xf32>, vector<32x32xf32>, vector<16x32xf32> -> vector<16x32xf32>
    %8 = vector.broadcast %3 : vector<1x32xf32> to vector<16x32xf32>
    %9 = arith.addf %7, %8 : vector<16x32xf32>
    %10 = math.tanh %9 : vector<16x32xf32>
    %11 = vector.broadcast %4 : vector<1x32xf32> to vector<16x32xf32>
    %12 = arith.mulf %10, %11 : vector<16x32xf32>
    %cst_3 = arith.constant dense<0.000000e+00> : vector<16xf32>
    %13 = vector.multi_reduction <add>, %12, %cst_3 [1] : vector<16x32xf32> to vector<16xf32>
    %14 = vector.shape_cast %13 : vector<16xf32> to vector<16x1xf32>
    %15 = vector.extract_strided_slice %14 {offsets = [0, 0], sizes = [8, 1], strides = [1, 1]} : vector<16x1xf32> to vector<8x1xf32>
    %cst_4 = arith.constant dense<0xFF800000> : vector<1xf32>
    %16 = vector.multi_reduction <maximumf>, %15, %cst_4 [0] : vector<8x1xf32> to vector<1xf32>
    %17 = vector.shape_cast %16 : vector<1xf32> to vector<1x1xf32>
    %18 = vector.broadcast %17 : vector<1x1xf32> to vector<8x1xf32>
    %19 = arith.subf %15, %18 : vector<8x1xf32>
    %20 = math.exp %19 : vector<8x1xf32>
    %cst_5 = arith.constant dense<0.000000e+00> : vector<1xf32>
    %21 = vector.multi_reduction <add>, %20, %cst_5 [0] : vector<8x1xf32> to vector<1xf32>
    %22 = vector.shape_cast %21 : vector<1xf32> to vector<1x1xf32>
    %23 = vector.broadcast %22 : vector<1x1xf32> to vector<8x1xf32>
    %24 = arith.divf %20, %23 : vector<8x1xf32>
    %25 = vector.extract_strided_slice %14 {offsets = [8, 0], sizes = [8, 1], strides = [1, 1]} : vector<16x1xf32> to vector<8x1xf32>
    %cst_6 = arith.constant dense<0xFF800000> : vector<1xf32>
    %26 = vector.multi_reduction <maximumf>, %25, %cst_6 [0] : vector<8x1xf32> to vector<1xf32>
    %27 = vector.shape_cast %26 : vector<1xf32> to vector<1x1xf32>
    %28 = vector.broadcast %27 : vector<1x1xf32> to vector<8x1xf32>
    %29 = arith.subf %25, %28 : vector<8x1xf32>
    %30 = math.exp %29 : vector<8x1xf32>
    %cst_7 = arith.constant dense<0.000000e+00> : vector<1xf32>
    %31 = vector.multi_reduction <add>, %30, %cst_7 [0] : vector<8x1xf32> to vector<1xf32>
    %32 = vector.shape_cast %31 : vector<1xf32> to vector<1x1xf32>
    %33 = vector.broadcast %32 : vector<1x1xf32> to vector<8x1xf32>
    %34 = arith.divf %30, %33 : vector<8x1xf32>
    %35 = tpu.concatenate %24, %34 in 0 : vector<8x1xf32>, vector<8x1xf32> -> vector<16x1xf32>
    %36 = vector.broadcast %35 : vector<16x1xf32> to vector<16x32xf32>
    %37 = arith.mulf %0, %36 : vector<16x32xf32>
    %38 = arith.addf %0, %37 : vector<16x32xf32>
    %cst_8 = arith.constant dense<0.000000e+00> : vector<16xf32>
    %39 = vector.multi_reduction <add>, %38, %cst_8 [1] : vector<16x32xf32> to vector<16xf32>
    %40 = vector.shape_cast %39 : vector<16xf32> to vector<16x1xf32>
    %cst_9 = arith.constant 3.200000e+01 : f32
    %41 = vector.broadcast %cst_9 : f32 to vector<16x1xf32>
    %42 = arith.divf %40, %41 : vector<16x1xf32>
    %43 = vector.broadcast %42 : vector<16x1xf32> to vector<16x32xf32>
    %44 = arith.subf %38, %43 : vector<16x32xf32>
    %45 = arith.mulf %44, %44 : vector<16x32xf32>
    %cst_10 = arith.constant dense<0.000000e+00> : vector<16xf32>
    %46 = vector.multi_reduction <add>, %45, %cst_10 [1] : vector<16x32xf32> to vector<16xf32>
    %47 = vector.shape_cast %46 : vector<16xf32> to vector<16x1xf32>
    %cst_11 = arith.constant 3.200000e+01 : f32
    %48 = vector.broadcast %cst_11 : f32 to vector<16x1xf32>
    %49 = arith.divf %47, %48 : vector<16x1xf32>
    %50 = vector.broadcast %42 : vector<16x1xf32> to vector<16x32xf32>
    %51 = arith.subf %38, %50 : vector<16x32xf32>
    %cst_12 = arith.constant 9.99999974E-6 : f32
    %52 = vector.broadcast %cst_12 : f32 to vector<16x1xf32>
    %53 = arith.addf %49, %52 : vector<16x1xf32>
    %54 = math.rsqrt %53 : vector<16x1xf32>
    %55 = vector.broadcast %54 : vector<16x1xf32> to vector<16x32xf32>
    %56 = arith.mulf %51, %55 : vector<16x32xf32>
    %57 = vector.broadcast %5 : vector<1x32xf32> to vector<16x32xf32>
    %58 = arith.mulf %56, %57 : vector<16x32xf32>
    %59 = vector.broadcast %6 : vector<1x32xf32> to vector<16x32xf32>
    %60 = arith.addf %58, %59 : vector<16x32xf32>
    %c0_13 = arith.constant 0 : index
    %c0_14 = arith.constant 0 : index
    %61 = vector.load %arg3[%c0_13, %c0_14] : memref<16x32xf32, #tpu.memory_space<vmem>>, vector<16x32xf32>
    tpu.vector_store %arg3[%c0_13, %c0_14], %60 {strides = array<i32>} : memref<16x32xf32, #tpu.memory_space<vmem>>, vector<16x32xf32>,
    return
  }
  func.func @transform_0(%arg0: i32) -> (i32, i32) {
    %c0_i32 = arith.constant 0 : i32
    %c0_i32_0 = arith.constant 0 : i32
    %c0_i32_1 = arith.constant 0 : i32
    return %c0_i32, %c0_i32_0 : i32, i32
  }
  func.func @transform_1(%arg0: i32) -> (i32, i32) {
    %c0_i32 = arith.constant 0 : i32
    %c0_i32_0 = arith.constant 0 : i32
    %c0_i32_1 = arith.constant 0 : i32
    return %c0_i32, %c0_i32_0 : i32, i32
  }
  func.func @transform_2(%arg0: i32) -> (i32, i32) {
    %c0_i32 = arith.constant 0 : i32
    %c0_i32_0 = arith.constant 0 : i32
    %c0_i32_1 = arith.constant 0 : i32
    return %c0_i32, %c0_i32_0 : i32, i32
  }
}

</mosaic_0001>

<bundles_post_ra>
// kernel: factor_attention_layer.1
= control target key start
LH: loop header
LB: loop body
LE: loop exit
PB: predicated region body
PF: predicated region fallthrough
CT: control target
= control target key end

     0   :  { %vm23_vm0 = vcmask 261120   ;;  %s362_s0 = inlined_call_operand.vmem [shape: f32[16,32], index: 0, kind: input, shape index: {}]   ;;  %s363_s1 = inlined_call_operand.vmem [shape: f32[40,32], index: 1, kind: input, shape index: {}]   ;;  %s364_s2 = inlined_call_operand.hbm [shape: f32[16,32], index: 2, kind: output, shape index: {}]  }
   0x1   :  { %v17_v0 = vld [vmem:[%s363_s1 + $0x18] sm:$0xff]  ;;  %v16_v1 = vld [vmem:[%s363_s1 + $0x10] sm:$0xff]  ;;  %v315_v2 = vld [vmem:[%s362_s0] sm:$0xff] }
   0x2   :  { %232 = vmatprep.subr.mxu0 %v17_v0  ;;  %v15_v3 = vld [vmem:[%s363_s1 + $0x8] sm:$0xff]  ;;  %240 = vmatprep.mubr.msk.f32.mxu0 %vm23_vm0, %v315_v2 }
   0x3   :  { %233 = vmatpush3.msra.mxu0 %v17_v0 }
   0x4   :  { %7 = vsyncpa [#allocation3], 0  ;;  %234 = vmatprep.subr.mxu0 %v16_v1  ;;  %v14_v4 = vld [vmem:[%s363_s1] sm:$0xff]  ;;  %v328_v5 = vld [vmem:[%s362_s0 + $0x8] sm:$0xff]  ;;  %v19_v6 = vlaneseq  ;;  %v287_v23 = vmov 0   ;;  %s288_s0 = smov [#allocation2]  }
   0x5   :  { %235 = vmatpush3.msra.mxu0 %v16_v1  ;;  %v338_v9 = vld [vmem:[%s363_s1 + $0x20] sm:$0xff]  ;;  %247 = vset.pattern.permute.xlu1 %v287_v23  ;;  %s213_s1 = sshll.u32 %s288_s0, 4  ;;  %s214_s1 = int_to_ptr.vmem [resolvable:$true] %s213_s1 }
   0x6   :  { %236 = vmatprep.subr.mxu0 %v15_v3  ;;  %v332_v7 = vshrl.u32 %v19_v6, 7  ;;  %248 = vset.pattern.permute.xlu0 %v287_v23  ;;  %s265_s23 = scalar_lea.vmem %s214_s1, 256  ;;  %p270_p1 = scmp.lt.s32.totalorder %s214_s1, %s214_s1 }
   0x7   :  { %237 = vmatpush3.msra.mxu0 %v15_v3  ;;  %p266_p0 = scmp.ne.s32.totalorder %s214_s1, %s265_s23  ;;  %p271_p2 = scmp.lt.s32.totalorder %s265_s23, %s265_s23 }
   0x8   :  { %238 = vmatprep.subr.mxu0 %v14_v4  ;;  %v21_v8 = vsub.s32 0, %v332_v7  ;;  %v109_v15 = vsub.s32 1, %v332_v7  ;;  %v202_v23 = vsub.s32 3, %v332_v7 }
   0x9   :  { %239 = vmatpush3.msra.mxu0 %v14_v4  ;;  %p272_p3 = por %p271_p2, %p270_p1 }
   0xa   :  { %241 = vmatmul.mubr.msk.f32.vlgmr.msra.gmra.mxu0 %vm23_vm0, %v328_v5  ;;  %v22_v10 = vrot.slane %v338_v9, %v21_v8  ;;  %v110_v17 = vrot.slane %v338_v9, %v109_v15 }
   0xb   :  { %p273_p4 = pnand %p272_p3, %p266_p0 }
  0xca   :  { %v242_v11 = vpop.f32.mrf.mxu0 }
  0xcb   :  { %v102_v12 = vadd.f32 %v242_v11, %v22_v10 }
  0xcc   :  { %v96_v13 = vpop.f32.mrf.mxu0 }
  0xcd   :  { %v97_v14 = vadd.f32 %v96_v13, %v22_v10  ;;  %249 = vtanh.f32 %v102_v12 }
  0xcf   :  { %251 = vtanh.f32 %v97_v14 }
  0xda   :  { %v250_v16 = vpop.eup %249 }
  0xdb   :  { %v112_v21 = vmul.f32 %v250_v16, %v110_v17 }
  0xdc   :  { %v252_v18 = vpop.eup %251 }
  0xdd   :  { %v111_v19 = vmul.f32 %v252_v18, %v110_v17  ;;  %v116_v22 = vsel %vm23_vm0, %v112_v21, 0.0 }
  0xdf   :  { %v113_v20 = vsel %vm23_vm0, %v111_v19, 0.0 }
  0xe0   :  { %114 = vadd.xlane.f32.xlu0 %v113_v20 }
  0xe4   :  { %117 = vadd.xlane.f32.xlu0 %v116_v22  ;;  %v196_v22 = vsub.s32 2, %v332_v7 }
 0x169   :  { %v115_v24 = vpop.xlane.xlu0 %114 }
 0x16a   :  { %v119_v25 = vrot.slane %v115_v24, 4 }
 0x16c   :  { %v120_v26 = vmax.f32 %v115_v24, %v119_v25 }
 0x16d   :  { %v118_v27 = vpop.xlane.xlu0 %117 }
 0x16e   :  { %v121_v28 = vrot.slane %v120_v26, 2  ;;  %v136_v29 = vrot.slane %v118_v27, 4 }
 0x170   :  { %v122_v30 = vmax.f32 %v120_v26, %v121_v28  ;;  %v137_v31 = vmax.f32 %v118_v27, %v136_v29  ;;  %v203_v26 = vrot.slane %v338_v9, %v202_v23 }
 0x172   :  { %v123_v32 = vrot.slane %v122_v30, 1  ;;  %v138_v33 = vrot.slane %v137_v31, 2 }
 0x174   :  { %v124_v34 = vmax.f32 %v122_v30, %v123_v32  ;;  %v139_v35 = vmax.f32 %v137_v31, %v138_v33 }
 0x176   :  { %v125_v36 = vsub.f32 %v115_v24, %v124_v34  ;;  %v140_v37 = vrot.slane %v139_v35, 1  ;;  %v197_v24 = vrot.slane %v338_v9, %v196_v22 }
 0x178   :  { %v126_v38 = vmul.f32 1.442695, %v125_v36  ;;  %v141_v39 = vmax.f32 %v139_v35, %v140_v37 }
 0x17a   :  { %253 = vpow2.f32 %v126_v38  ;;  %v142_v40 = vsub.f32 %v118_v27, %v141_v39 }
 0x17c   :  { %v143_v41 = vmul.f32 1.442695, %v142_v40 }
 0x17e   :  { %255 = vpow2.f32 %v143_v41 }
 0x187   :  { %v254_v42 = vpop.eup %253 }
 0x188   :  { %v128_v43 = vrot.slane %v254_v42, 4 }
 0x18a   :  { %v129_v44 = vadd.f32 %v254_v42, %v128_v43 }
 0x18b   :  { %v256_v45 = vpop.eup %255 }
 0x18c   :  { %v130_v46 = vrot.slane %v129_v44, 2  ;;  %v145_v47 = vrot.slane %v256_v45, 4 }
 0x18e   :  { %v131_v48 = vadd.f32 %v130_v46, %v129_v44  ;;  %v146_v49 = vadd.f32 %v256_v45, %v145_v47 }
 0x190   :  { %v132_v50 = vrot.slane %v131_v48, 1  ;;  %v147_v51 = vrot.slane %v146_v49, 2 }
 0x192   :  { %v133_v52 = vadd.f32 %v132_v50, %v131_v48  ;;  %v148_v53 = vadd.f32 %v147_v51, %v146_v49 }
 0x194   :  { %257 = vrcp.f32 %v133_v52  ;;  %v149_v54 = vrot.slane %v148_v53, 1 }
 0x196   :  { %v150_v55 = vadd.f32 %v149_v54, %v148_v53 }
 0x198   :  { %259 = vrcp.f32 %v150_v55 }
 0x1a1   :  { %v258_v56 = vpop.eup %257 }
 0x1a2   :  { %v135_v57 = vmul.f32 %v258_v56, %v254_v42 }
 0x1a4   :  { %155 = vperm.xlu1 %247, %v135_v57  }
 0x1a5   :  { %v260_v58 = vpop.eup %259 }
 0x1a6   :  { %v152_v59 = vmul.f32 %v260_v58, %v256_v45 }
 0x1a8   :  { %160 = vperm.xlu1 %247, %v152_v59  }
 0x21f   :  { %v156_v60 = vpop.permute.xlu1 %155 }
 0x220   :  { %v163_v61 = vmul.f32 %v156_v60, %v315_v2 }
 0x222   :  { %v165_v62 = vadd.f32 %v163_v61, %v315_v2 }
 0x223   :  { %v161_v63 = vpop.permute.xlu1 %160 }
 0x224   :  { %v164_v0 = vmul.f32 %v161_v63, %v328_v5  ;;  %v167_v1 = vsel %vm23_vm0, %v165_v62, 0.0 }
 0x225   :  { %168 = vadd.xlane.f32.xlu0 %v167_v1 }
 0x226   :  { %v166_v3 = vadd.f32 %v164_v0, %v328_v5 }
 0x228   :  { %v170_v4 = vsel %vm23_vm0, %v166_v3, 0.0 }
 0x229   :  { %171 = vadd.xlane.f32.xlu1 %v170_v4 }
 0x2ae   :  { %v169_v6 = vpop.xlane.xlu0 %168 }
 0x2af   :  { %v174_v8 = vmul.f32 0.03125, %v169_v6 }
 0x2b1   :  { %v176_v10 = vsub.f32 %v165_v62, %v174_v8 }
 0x2b2   :  { %v172_v11 = vpop.xlane.xlu1 %171 }
 0x2b3   :  { %v175_v12 = vmul.f32 0.03125, %v172_v11  ;;  %v178_v13 = vmul.f32 %v176_v10, %v176_v10 }
 0x2b5   :  { %v177_v14 = vsub.f32 %v166_v3, %v175_v12  ;;  %v180_v2 = vsel %vm23_vm0, %v178_v13, 0.0 }
 0x2b6   :  { %181 = vadd.xlane.f32.xlu0 %v180_v2 }
 0x2b7   :  { %v179_v15 = vmul.f32 %v177_v14, %v177_v14 }
 0x2b9   :  { %v183_v16 = vsel %vm23_vm0, %v179_v15, 0.0 }
 0x2ba   :  { %184 = vadd.xlane.f32.xlu0 %v183_v16 }
 0x33f   :  { %v182_v17 = vpop.xlane.xlu0 %181 }
 0x340   :  { %v186_v18 = vmul.f32 0.03125, %v182_v17 }
 0x342   :  { %v188_v5 = vadd.f32 1e-05, %v186_v18 }
 0x343   :  { %v185_v19 = vpop.xlane.xlu0 %184 }
 0x344   :  { %261 = vrsqrt.f32 %v188_v5  ;;  %v187_v20 = vmul.f32 0.03125, %v185_v19 }
 0x346   :  { %v189_v21 = vadd.f32 1e-05, %v187_v20 }
 0x348   :  { %263 = vrsqrt.f32 %v189_v21 }
 0x351   :  { %v262_v25 = vpop.eup %261 }
 0x352   :  { %v192_v27 = vmul.f32 %v262_v25, %v176_v10 }
 0x354   :  { %v198_v28 = vmul.f32 %v197_v24, %v192_v27 }
 0x355   :  { %v264_v29 = vpop.eup %263 }
 0x356   :  { %v193_v30 = vmul.f32 %v264_v29, %v177_v14  ;;  %v204_v31 = vadd.f32 %v203_v26, %v198_v28 }
 0x358   :  { %v199_v32 = vmul.f32 %v197_v24, %v193_v30  ;;  %206 = vst.msk [vmem:[#allocation2] sm:$0xff] %vm23_vm0, %v204_v31 }
 0x35a   :  { %v205_v33 = vadd.f32 %v203_v26, %v199_v32 }
 0x35c   :  { %207 = vst.msk [vmem:[#allocation2 + $0x8] sm:$0xff] %vm23_vm0, %v205_v33 }
 0x35d   :  { %276 = shalt.err (!%p273_p4)
}
 0x35e   :  { %s289_s24 = smov 128   ;;  %s290_s25 = smov 8  }
 0x35f   :  { %219 = dma.vmem_to_hbm [thread:$0]  %s214_s1, 256, %s364_s2, [#allocation3], %s289_s24, %s289_s24, %s290_s25  }
 0x360   :  { %285 = dma.done.wait [#allocation3], 256  }
 0x361   :  { %286 = vsyncadd [#allocation3], 4294967040 }
 0x362   :  { %223 = vsyncpa [#allocation3], 1 }

</bundles_post_ra>
